<compile_context>
chip_gen: v6e
topology: v6e:2x2x1
jax: 0.10.0
libtpu: 0.0.40
codegen_flags: <defaults>
</compile_context>

<pallas_src>
import functools

import jax
import jax.numpy as jnp
from jax.experimental import pallas as pl
from jax.experimental.pallas import tpu as pltpu


def _encoder_kernel(ts_ref, dem_ref,
                    dw1_ref, db1_ref, dw2_ref, db2_ref,
                    w1_ref, b1_ref, w2_ref, b2_ref,
                    out_ref, *, seq_len):
    """One batch tile: M = B*L flattened (batch, time) rows, channels last.

    ts_ref : (M, C_ts)        bf16  timestep embeddings
    dem_ref: (B, D)           bf16  raw demographics (one row per sample)
    dw*/db*: dem_fc weights (bf16) / biases (f32)
    w*     : (3, C_in, C_out) bf16  conv taps (tap 0 -> x[l-1], 1 -> x[l], 2 -> x[l+1])
    b*     : (1, C_out)       f32
    out_ref: (M, 2*H)         bf16
    """
    M, _ = ts_ref.shape
    L = seq_len
    B = M // L
    f32 = jnp.float32
    bf16 = jnp.bfloat16

    # ---- dem_fc on B rows (NOT M = B*L rows):
    #      Linear(D,40) -> ReLU -> (Dropout=id) -> Linear(40,20) -> ReLU
    #      bf16 MXU operands, f32 accumulation / bias / ReLU.
    dem = dem_ref[...]
    h = jnp.dot(dem, dw1_ref[...], preferred_element_type=f32) + db1_ref[...]
    h = jnp.maximum(h, 0.0).astype(bf16)
    d = jnp.dot(h, dw2_ref[...], preferred_element_type=f32) + db2_ref[...]
    d = jnp.maximum(d, 0.0).astype(bf16)                              # (B, 20)

    # Broadcast each sample's demographics across its L timesteps inside VMEM
    # (no (N*L, D) HBM materialization in the wrapper).
    Dd = d.shape[-1]
    d_rows = jnp.broadcast_to(d[:, None, :], (B, L, Dd)).reshape(M, Dd)

    x = jnp.concatenate([ts_ref[...], d_rows], axis=-1)               # (M, C_in) bf16

    # Per-sample conv boundaries on the flat row view: a sample's row t==0 has no
    # left neighbour, t==L-1 no right neighbour.  Valid for any L (no L%8 padding
    # needed) because every tile covers whole samples (M = B*L).
    t = jax.lax.broadcasted_iota(jnp.int32, (M, 1), 0) % L
    not_first = t != 0
    not_last = t != (L - 1)

    def conv3_relu(xr, w_ref, b_ref):
        # Conv1d(k=3, padding=1) + bias + ReLU as three accumulated matmuls on the
        # row-shifted views: y = x[l-1]@w0 + x[l]@w1 + x[l+1]@w2.
        # No (M, 3C) concat buffer and no zero K-padding of the weights.
        C = xr.shape[-1]
        zrow = jnp.zeros((1, C), xr.dtype)
        x_prev = jnp.where(not_first, jnp.concatenate([zrow, xr[:-1, :]], axis=0), 0)
        x_next = jnp.where(not_last, jnp.concatenate([xr[1:, :], zrow], axis=0), 0)
        y = (jnp.dot(x_prev, w_ref[0], preferred_element_type=f32)
             + jnp.dot(xr, w_ref[1], preferred_element_type=f32)
             + jnp.dot(x_next, w_ref[2], preferred_element_type=f32)
             + b_ref[...])
        return jnp.maximum(y, 0.0)                                    # f32

    y1 = conv3_relu(x, w1_ref, b1_ref).astype(bf16)                   # (M, H)
    y2 = conv3_relu(y1, w2_ref, b2_ref)                               # (M, 2H) f32
    # The module's trailing F.relu is a no-op after the conv ReLU above.
    out_ref[...] = y2.astype(out_ref.dtype)


def _num_tensorcores():
    """Best-effort TensorCore count of the local device (v7x: 2, v5e/v6e: 1)."""
    try:
        dev = jax.devices()[0]
        nc = getattr(dev, "num_cores", None)
        if isinstance(nc, int) and nc >= 1:
            return nc
        if "v7" in (getattr(dev, "device_kind", "") or "").lower():
            return 2
    except Exception:
        pass
    return 1


def _pick_batch_tile(N, L, c_in, h, n_cores, *, vmem_budget_bytes=12 * 1024 * 1024):
    """Largest batch tile B dividing N whose M = B*L rows keep the estimated per-tile
    VMEM footprint within budget.  On multi-TensorCore parts (v7x) keep >= n_cores
    grid tiles so every core gets work; on single-core parts take the biggest tile."""
    h2 = 2 * h
    # Rough per-row VMEM bytes: bf16 x/x_prev/x_next + double-buffered bf16 in/out
    # blocks + bf16 y1 shifts, plus f32 conv accumulators.
    per_row = 2 * (5 * c_in + 3 * h + 2 * h2) + 4 * (h + 2 * h2)
    target_rows = max(512, min(4096, vmem_budget_bytes // max(per_row, 1)))

    divisors = [b for b in range(1, N + 1) if N % b == 0]
    # A tile smaller than the full batch must keep blocks sublane-aligned for bf16:
    # B % 16 == 0 (which also makes M = B*L a multiple of 16).
    valid = [b for b in divisors if b == N or b % 16 == 0]
    fitting = [b for b in valid if b * L <= target_rows] or [min(valid)]
    B = max(fitting)
    if n_cores > 1:
        multi = [b for b in fitting if N // b >= n_cores]
        if multi:
            B = max(multi)
    return B


def patient_cnn_encoder(timesteps, dem, params, *, batch_tile=None):
    """timesteps: (N, L, C_ts) f32;  dem: (N, D) f32  ->  (N, L, 2*H) bf16."""
    N, L, C_ts = timesteps.shape
    D = dem.shape[-1]
    dw1, db1, dw2, db2, c1w, c1b, c2w, c2b = params
    _, C_in, H = c1w.shape
    H2 = c2w.shape[2]
    assert C_in == C_ts + dw2.shape[1], "conv-1 input width must be C_ts + dem_fc width"

    bf16, f32 = jnp.bfloat16, jnp.float32

    # bf16 for every MXU operand and all HBM traffic; accumulation/bias/ReLU stay f32.
    ts_rows = timesteps.reshape(N * L, C_ts).astype(bf16)
    dem_b = dem.astype(bf16)
    dw1_b, dw2_b = dw1.astype(bf16), dw2.astype(bf16)
    w1_b, w2_b = c1w.astype(bf16), c2w.astype(bf16)
    db1_f, db2_f = db1.astype(f32), db2.astype(f32)
    b1_f, b2_f = c1b.astype(f32), c2b.astype(f32)

    n_cores = _num_tensorcores()
    B = batch_tile if batch_tile is not None else _pick_batch_tile(N, L, C_in, H, n_cores)
    if N % B != 0 or not (B == N or B % 16 == 0):
        raise ValueError(
            f"batch tile {B} must divide N={N} and be a multiple of 16 (or equal N)")
    M = B * L

    def full_spec(a):
        nd = a.ndim
        return pl.BlockSpec(a.shape, lambda n, _nd=nd: (0,) * _nd)

    grid_spec = pltpu.PrefetchScalarGridSpec(
        num_scalar_prefetch=0,
        grid=(N // B,),
        in_specs=[
            pl.BlockSpec((M, C_ts), lambda n: (n, 0)),   # timestep rows (bf16)
            pl.BlockSpec((B, D), lambda n: (n, 0)),      # one raw dem row per sample
            full_spec(dw1_b), full_spec(db1_f), full_spec(dw2_b), full_spec(db2_f),
            full_spec(w1_b), full_spec(b1_f), full_spec(w2_b), full_spec(b2_f),
        ],
        # Output is written at its real width: no 128-lane zero padding and no
        # wrapper re-slice.  For pat_hidden_size >= 64 (H2 % 128 == 0) the store is
        # also fully lane-dense.
        out_specs=pl.BlockSpec((M, H2), lambda n: (n, 0)),
    )

    out_rows = pl.pallas_call(
        functools.partial(_encoder_kernel, seq_len=L),
        out_shape=jax.ShapeDtypeStruct((N * L, H2), bf16),
        grid_spec=grid_spec,
        compiler_params=pltpu.CompilerParams(
            dimension_semantics=("parallel",),
            # Raise v5e's 16 MiB scoped-VMEM default so multi-thousand-row tiles fit;
            # 32 MiB is within every generation's scoped limit (v7x default).
            vmem_limit_bytes=32 * 1024 * 1024,
        ),
    )(ts_rows, dem_b, dw1_b, db1_f, dw2_b, db2_f, w1_b, b1_f, w2_b, b2_f)

    return out_rows.reshape(N, L, H2)


def make_params(key, input_size, dem_size, pat_hidden_size):
    """Deterministic synthetic parameters (weights stored ready for x @ W matmuls)."""
    C_in = input_size + 20
    H = pat_hidden_size
    ks = jax.random.split(key, 8)

    def init(k, shape, fan_in):
        return jax.random.normal(k, shape, jnp.float32) / jnp.sqrt(float(fan_in))

    dw1 = init(ks[0], (dem_size, 40), dem_size)
    db1 = init(ks[1], (1, 40), 40)
    dw2 = init(ks[2], (40, 20), 40)
    db2 = init(ks[3], (1, 20), 20)
    # Conv weights stored as (kernel_tap, C_in, C_out) == PyTorch (C_out, C_in, k).transpose(2, 1, 0);
    # tap 0 multiplies x[l-1], tap 1 x[l], tap 2 x[l+1].
    c1w = init(ks[4], (3, C_in, H), 3 * C_in)
    c1b = init(ks[5], (1, H), H)
    c2w = init(ks[6], (3, H, 2 * H), 3 * H)
    c2b = init(ks[7], (1, 2 * H), 2 * H)
    return (dw1, db1, dw2, db2, c1w, c1b, c2w, c2b)


def reference(timesteps, dem, params):
    """Pure-JAX reference of the same forward pass, mirroring the kernel's bf16
    quantization points and using true-f32 contractions (precision=HIGHEST)."""
    dw1, db1, dw2, db2, c1w, c1b, c2w, c2b = params
    N, L, _ = timesteps.shape
    hi = jax.lax.Precision.HIGHEST
    q = lambda a: a.astype(jnp.bfloat16).astype(jnp.float32)   # bf16 round-trip

    h = jax.nn.relu(jnp.dot(q(dem), q(dw1), precision=hi) + db1)
    d = jax.nn.relu(jnp.dot(q(h), q(dw2), precision=hi) + db2)          # (N, 20)
    x = jnp.concatenate(
        [q(timesteps), jnp.broadcast_to(q(d)[:, None, :], (N, L, d.shape[-1]))], -1)

    def conv(x, w, b):
        xp = jnp.pad(x, ((0, 0), (1, 1), (0, 0)))
        y = sum(jnp.einsum("nlc,cd->nld", xp[:, k:k + L], q(w[k]), precision=hi)
                for k in range(3))
        return jax.nn.relu(y + b[0])

    y1 = conv(x, c1w, c1b)
    y2 = conv(q(y1), c2w, c2b)
    return jax.nn.relu(y2)   # module's trailing F.relu (no-op after the conv ReLU)


if __name__ == "__main__":
    # Small shapes consistent with the module's forward.
    N, L = 2, 8
    input_size = 32          # timestep embedding channels (C)
    dem_size = 10
    pat_hidden_size = 32     # -> out_size = 64

    key = jax.random.PRNGKey(0)
    k_ts, k_dem, k_par = jax.random.split(key, 3)
    timesteps = jax.random.normal(k_ts, (N, L, input_size), jnp.float32)
    dem = jax.random.normal(k_dem, (N, dem_size), jnp.float32)
    params = make_params(k_par, input_size, dem_size, pat_hidden_size)

    out = patient_cnn_encoder(timesteps, dem, params)
    out = jax.block_until_ready(out)
    assert out.shape == (N, L, 2 * pat_hidden_size)
    assert out.dtype == jnp.bfloat16

    ref = reference(timesteps, dem, params)
    # The reference mirrors every bf16 quantization point of the kernel and uses
    # precision=HIGHEST, so the only residual differences are the final bf16
    # rounding of the kernel output (<= 2^-9 relative) plus f32 accumulation-order
    # noise; structural bugs would show up as O(1) errors.
    assert jnp.allclose(out.astype(jnp.float32), ref, rtol=5e-3, atol=5e-3), \
        "mismatch vs JAX reference"

    print("KERNEL_OK")
</pallas_src>

<mosaic_0001>
module attributes {stable_mosaic.version = 11 : i64} {
  func.func @_encoder_kernel(%arg0: i32, %arg1: memref<16x32xbf16, #tpu.memory_space<vmem>>, %arg2: memref<2x10xbf16, #tpu.memory_space<vmem>>, %arg3: memref<10x40xbf16, #tpu.memory_space<vmem>>, %arg4: memref<1x40xf32, #tpu.memory_space<vmem>>, %arg5: memref<40x20xbf16, #tpu.memory_space<vmem>>, %arg6: memref<1x20xf32, #tpu.memory_space<vmem>>, %arg7: memref<3x52x32xbf16, #tpu.memory_space<vmem>>, %arg8: memref<1x32xf32, #tpu.memory_space<vmem>>, %arg9: memref<3x32x64xbf16, #tpu.memory_space<vmem>>, %arg10: memref<1x64xf32, #tpu.memory_space<vmem>>, %arg11: memref<16x64xbf16, #tpu.memory_space<vmem>>) attributes {dimension_semantics = [#tpu.dimension_semantics<parallel>], iteration_bounds = array<i64: 1>, scalar_prefetch = 0 : i64, scratch_operands = 0 : i64, tpu.core_type = #tpu.core_type<tc>, window_params = [{transform_indices = @transform_0, window_bounds = array<i64: 16, 32>}, {transform_indices = @transform_1, window_bounds = array<i64: 2, 10>}, {pipeline_mode = #tpu.pipeline_mode<synchronous>, transform_indices = @transform_2, window_bounds = array<i64: 10, 40>}, {pipeline_mode = #tpu.pipeline_mode<synchronous>, transform_indices = @transform_3, window_bounds = array<i64: 1, 40>}, {pipeline_mode = #tpu.pipeline_mode<synchronous>, transform_indices = @transform_4, window_bounds = array<i64: 40, 20>}, {pipeline_mode = #tpu.pipeline_mode<synchronous>, transform_indices = @transform_5, window_bounds = array<i64: 1, 20>}, {pipeline_mode = #tpu.pipeline_mode<synchronous>, transform_indices = @transform_6, window_bounds = array<i64: 3, 52, 32>}, {pipeline_mode = #tpu.pipeline_mode<synchronous>, transform_indices = @transform_7, window_bounds = array<i64: 1, 32>}, {pipeline_mode = #tpu.pipeline_mode<synchronous>, transform_indices = @transform_8, window_bounds = array<i64: 3, 32, 64>}, {pipeline_mode = #tpu.pipeline_mode<synchronous>, transform_indices = @transform_9, window_bounds = array<i64: 1, 64>}, {transform_indices = @transform_10, window_bounds = array<i64: 16, 64>}]} {
    %c0 = arith.constant 0 : index
    %c0_0 = arith.constant 0 : index
    %0 = vector.load %arg2[%c0, %c0_0] : memref<2x10xbf16, #tpu.memory_space<vmem>>, vector<2x10xbf16>
    %c0_1 = arith.constant 0 : index
    %c0_2 = arith.constant 0 : index
    %1 = vector.load %arg3[%c0_1, %c0_2] : memref<10x40xbf16, #tpu.memory_space<vmem>>, vector<10x40xbf16>
    %cst = arith.constant dense<0.000000e+00> : vector<2x40xf32>
    %2 = tpu.matmul %0, %1, %cst {dimension_numbers = #tpu.dot_dimension_numbers<[1], [0], [0], [1], [0, 0, 1, 1], [], []>} : vector<2x10xbf16>, vector<10x40xbf16>, vector<2x40xf32> -> vector<2x40xf32>
    %c0_3 = arith.constant 0 : index
    %c0_4 = arith.constant 0 : index
    %3 = vector.load %arg4[%c0_3, %c0_4] : memref<1x40xf32, #tpu.memory_space<vmem>>, vector<1x40xf32>
    %4 = vector.broadcast %3 : vector<1x40xf32> to vector<2x40xf32>
    %5 = arith.addf %2, %4 : vector<2x40xf32>
    %cst_5 = arith.constant 0.000000e+00 : f32
    %6 = vector.broadcast %cst_5 : f32 to vector<2x40xf32>
    %7 = arith.maximumf %5, %6 : vector<2x40xf32>
    %8 = arith.truncf %7 : vector<2x40xf32> to vector<2x40xbf16>
    %c0_6 = arith.constant 0 : index
    %c0_7 = arith.constant 0 : index
    %9 = vector.load %arg5[%c0_6, %c0_7] : memref<40x20xbf16, #tpu.memory_space<vmem>>, vector<40x20xbf16>
    %cst_8 = arith.constant dense<0.000000e+00> : vector<2x20xf32>
    %10 = tpu.matmul %8, %9, %cst_8 {dimension_numbers = #tpu.dot_dimension_numbers<[1], [0], [0], [1], [0, 0, 1, 1], [], []>} : vector<2x40xbf16>, vector<40x20xbf16>, vector<2x20xf32> -> vector<2x20xf32>
    %c0_9 = arith.constant 0 : index
    %c0_10 = arith.constant 0 : index
    %11 = vector.load %arg6[%c0_9, %c0_10] : memref<1x20xf32, #tpu.memory_space<vmem>>, vector<1x20xf32>
    %12 = vector.broadcast %11 : vector<1x20xf32> to vector<2x20xf32>
    %13 = arith.addf %10, %12 : vector<2x20xf32>
    %cst_11 = arith.constant 0.000000e+00 : f32
    %14 = vector.broadcast %cst_11 : f32 to vector<2x20xf32>
    %15 = arith.maximumf %13, %14 : vector<2x20xf32>
    %16 = arith.truncf %15 : vector<2x20xf32> to vector<2x20xbf16>
    %17 = vector.shape_cast %16 : vector<2x20xbf16> to vector<2x1x20xbf16>
    %18 = vector.shape_cast %17 : vector<2x1x20xbf16> to vector<2x1x20xbf16>
    %19 = vector.broadcast %18 : vector<2x1x20xbf16> to vector<2x8x20xbf16>
    %20 = vector.shape_cast %19 : vector<2x8x20xbf16> to vector<16x20xbf16>
    %c0_12 = arith.constant 0 : index
    %c0_13 = arith.constant 0 : index
    %21 = vector.load %arg1[%c0_12, %c0_13] : memref<16x32xbf16, #tpu.memory_space<vmem>>, vector<16x32xbf16>
    %22 = tpu.concatenate %21, %20 in 1 : vector<16x32xbf16>, vector<16x20xbf16> -> vector<16x52xbf16>
    %23 = tpu.iota {dimensions = array<i32: 0>} : vector<16x1xi32>
    %c8_i32 = arith.constant 8 : i32
    %c0_i32 = arith.constant 0 : i32
    %24 = arith.cmpi eq, %c8_i32, %c0_i32 : i32
    %c1_i32 = arith.constant 1 : i32
    %25 = arith.select %24, %c1_i32, %c8_i32 : i32
    %26 = vector.broadcast %25 : i32 to vector<16x1xi32>
    %27 = arith.remsi %23, %26 : vector<16x1xi32>
    %c0_i32_14 = arith.constant 0 : i32
    %28 = vector.broadcast %c0_i32_14 : i32 to vector<16x1xi32>
    %29 = arith.cmpi ne, %27, %28 : vector<16x1xi32>
    %c0_i32_15 = arith.constant 0 : i32
    %30 = vector.broadcast %c0_i32_15 : i32 to vector<16x1xi32>
    %31 = arith.cmpi slt, %27, %30 : vector<16x1xi32>
    %c0_i32_16 = arith.constant 0 : i32
    %32 = arith.cmpi slt, %25, %c0_i32_16 : i32
    %33 = vector.broadcast %32 : i1 to vector<16x1xi1>
    %34 = vector.broadcast %33 : vector<16x1xi1> to vector<16x1xi1>
    %35 = arith.xori %31, %34 : vector<16x1xi1>
    %36 = arith.andi %35, %29 : vector<16x1xi1>
    %37 = vector.broadcast %25 : i32 to vector<16x1xi32>
    %38 = arith.addi %27, %37 : vector<16x1xi32>
    %39 = arith.select %36, %38, %27 : vector<16x1xi1>, vector<16x1xi32>
    %c0_i32_17 = arith.constant 0 : i32
    %40 = vector.broadcast %c0_i32_17 : i32 to vector<16x1xi32>
    %41 = arith.cmpi ne, %39, %40 : vector<16x1xi32>
    %c7_i32 = arith.constant 7 : i32
    %42 = vector.broadcast %c7_i32 : i32 to vector<16x1xi32>
    %43 = arith.cmpi ne, %39, %42 : vector<16x1xi32>
    %cst_18 = arith.constant 0.000000e+00 : bf16
    %44 = vector.broadcast %cst_18 : bf16 to vector<1x52xbf16>
    %45 = vector.extract_strided_slice %22 {offsets = [0, 0], sizes = [15, 52], strides = [1, 1]} : vector<16x52xbf16> to vector<15x52xbf16>
    %46 = tpu.concatenate %44, %45 in 0 : vector<1x52xbf16>, vector<15x52xbf16> -> vector<16x52xbf16>
    %c0_i32_19 = arith.constant 0 : i32
    %47 = arith.sitofp %c0_i32_19 : i32 to bf16
    %48 = vector.shape_cast %41 : vector<16x1xi1> to vector<16x1xi1>
    %49 = vector.broadcast %48 : vector<16x1xi1> to vector<16x52xi1>
    %50 = vector.broadcast %47 : bf16 to vector<16x52xbf16>
    %51 = arith.select %49, %46, %50 : vector<16x52xi1>, vector<16x52xbf16>
    %52 = vector.extract_strided_slice %22 {offsets = [1, 0], sizes = [15, 52], strides = [1, 1]} : vector<16x52xbf16> to vector<15x52xbf16>
    %53 = tpu.concatenate %52, %44 in 0 : vector<15x52xbf16>, vector<1x52xbf16> -> vector<16x52xbf16>
    %c0_i32_20 = arith.constant 0 : i32
    %54 = arith.sitofp %c0_i32_20 : i32 to bf16
    %55 = vector.shape_cast %43 : vector<16x1xi1> to vector<16x1xi1>
    %56 = vector.broadcast %55 : vector<16x1xi1> to vector<16x52xi1>
    %57 = vector.broadcast %54 : bf16 to vector<16x52xbf16>
    %58 = arith.select %56, %53, %57 : vector<16x52xi1>, vector<16x52xbf16>
    %c0_21 = arith.constant 0 : index
    %c0_22 = arith.constant 0 : index
    %c0_23 = arith.constant 0 : index
    %59 = vector.load %arg7[%c0_21, %c0_22, %c0_23] : memref<3x52x32xbf16, #tpu.memory_space<vmem>>, vector<1x52x32xbf16>
    %60 = vector.shape_cast %59 : vector<1x52x32xbf16> to vector<52x32xbf16>
    %cst_24 = arith.constant dense<0.000000e+00> : vector<16x32xf32>
    %61 = tpu.matmul %51, %60, %cst_24 {dimension_numbers = #tpu.dot_dimension_numbers<[1], [0], [0], [1], [0, 0, 1, 1], [], []>} : vector<16x52xbf16>, vector<52x32xbf16>, vector<16x32xf32> -> vector<16x32xf32>
    %c1 = arith.constant 1 : index
    %c0_25 = arith.constant 0 : index
    %c0_26 = arith.constant 0 : index
    %62 = vector.load %arg7[%c1, %c0_25, %c0_26] : memref<3x52x32xbf16, #tpu.memory_space<vmem>>, vector<1x52x32xbf16>
    %63 = vector.shape_cast %62 : vector<1x52x32xbf16> to vector<52x32xbf16>
    %cst_27 = arith.constant dense<0.000000e+00> : vector<16x32xf32>
    %64 = tpu.matmul %22, %63, %cst_27 {dimension_numbers = #tpu.dot_dimension_numbers<[1], [0], [0], [1], [0, 0, 1, 1], [], []>} : vector<16x52xbf16>, vector<52x32xbf16>, vector<16x32xf32> -> vector<16x32xf32>
    %65 = arith.addf %61, %64 : vector<16x32xf32>
    %c2 = arith.constant 2 : index
    %c0_28 = arith.constant 0 : index
    %c0_29 = arith.constant 0 : index
    %66 = vector.load %arg7[%c2, %c0_28, %c0_29] : memref<3x52x32xbf16, #tpu.memory_space<vmem>>, vector<1x52x32xbf16>
    %67 = vector.shape_cast %66 : vector<1x52x32xbf16> to vector<52x32xbf16>
    %cst_30 = arith.constant dense<0.000000e+00> : vector<16x32xf32>
    %68 = tpu.matmul %58, %67, %cst_30 {dimension_numbers = #tpu.dot_dimension_numbers<[1], [0], [0], [1], [0, 0, 1, 1], [], []>} : vector<16x52xbf16>, vector<52x32xbf16>, vector<16x32xf32> -> vector<16x32xf32>
    %69 = arith.addf %65, %68 : vector<16x32xf32>
    %c0_31 = arith.constant 0 : index
    %c0_32 = arith.constant 0 : index
    %70 = vector.load %arg8[%c0_31, %c0_32] : memref<1x32xf32, #tpu.memory_space<vmem>>, vector<1x32xf32>
    %71 = vector.broadcast %70 : vector<1x32xf32> to vector<16x32xf32>
    %72 = arith.addf %69, %71 : vector<16x32xf32>
    %cst_33 = arith.constant 0.000000e+00 : f32
    %73 = vector.broadcast %cst_33 : f32 to vector<16x32xf32>
    %74 = arith.maximumf %72, %73 : vector<16x32xf32>
    %75 = arith.truncf %74 : vector<16x32xf32> to vector<16x32xbf16>
    %cst_34 = arith.constant 0.000000e+00 : bf16
    %76 = vector.broadcast %cst_34 : bf16 to vector<1x32xbf16>
    %77 = vector.extract_strided_slice %75 {offsets = [0, 0], sizes = [15, 32], strides = [1, 1]} : vector<16x32xbf16> to vector<15x32xbf16>
    %78 = tpu.concatenate %76, %77 in 0 : vector<1x32xbf16>, vector<15x32xbf16> -> vector<16x32xbf16>
    %c0_i32_35 = arith.constant 0 : i32
    %79 = arith.sitofp %c0_i32_35 : i32 to bf16
    %80 = vector.shape_cast %41 : vector<16x1xi1> to vector<16x1xi1>
    %81 = vector.broadcast %80 : vector<16x1xi1> to vector<16x32xi1>
    %82 = vector.broadcast %79 : bf16 to vector<16x32xbf16>
    %83 = arith.select %81, %78, %82 : vector<16x32xi1>, vector<16x32xbf16>
    %84 = vector.extract_strided_slice %75 {offsets = [1, 0], sizes = [15, 32], strides = [1, 1]} : vector<16x32xbf16> to vector<15x32xbf16>
    %85 = tpu.concatenate %84, %76 in 0 : vector<15x32xbf16>, vector<1x32xbf16> -> vector<16x32xbf16>
    %c0_i32_36 = arith.constant 0 : i32
    %86 = arith.sitofp %c0_i32_36 : i32 to bf16
    %87 = vector.shape_cast %43 : vector<16x1xi1> to vector<16x1xi1>
    %88 = vector.broadcast %87 : vector<16x1xi1> to vector<16x32xi1>
    %89 = vector.broadcast %86 : bf16 to vector<16x32xbf16>
    %90 = arith.select %88, %85, %89 : vector<16x32xi1>, vector<16x32xbf16>
    %c0_37 = arith.constant 0 : index
    %c0_38 = arith.constant 0 : index
    %c0_39 = arith.constant 0 : index
    %91 = vector.load %arg9[%c0_37, %c0_38, %c0_39] : memref<3x32x64xbf16, #tpu.memory_space<vmem>>, vector<1x32x64xbf16>
    %92 = vector.shape_cast %91 : vector<1x32x64xbf16> to vector<32x64xbf16>
    %cst_40 = arith.constant dense<0.000000e+00> : vector<16x64xf32>
    %93 = tpu.matmul %83, %92, %cst_40 {dimension_numbers = #tpu.dot_dimension_numbers<[1], [0], [0], [1], [0, 0, 1, 1], [], []>} : vector<16x32xbf16>, vector<32x64xbf16>, vector<16x64xf32> -> vector<16x64xf32>
    %c1_41 = arith.constant 1 : index
    %c0_42 = arith.constant 0 : index
    %c0_43 = arith.constant 0 : index
    %94 = vector.load %arg9[%c1_41, %c0_42, %c0_43] : memref<3x32x64xbf16, #tpu.memory_space<vmem>>, vector<1x32x64xbf16>
    %95 = vector.shape_cast %94 : vector<1x32x64xbf16> to vector<32x64xbf16>
    %cst_44 = arith.constant dense<0.000000e+00> : vector<16x64xf32>
    %96 = tpu.matmul %75, %95, %cst_44 {dimension_numbers = #tpu.dot_dimension_numbers<[1], [0], [0], [1], [0, 0, 1, 1], [], []>} : vector<16x32xbf16>, vector<32x64xbf16>, vector<16x64xf32> -> vector<16x64xf32>
    %97 = arith.addf %93, %96 : vector<16x64xf32>
    %c2_45 = arith.constant 2 : index
    %c0_46 = arith.constant 0 : index
    %c0_47 = arith.constant 0 : index
    %98 = vector.load %arg9[%c2_45, %c0_46, %c0_47] : memref<3x32x64xbf16, #tpu.memory_space<vmem>>, vector<1x32x64xbf16>
    %99 = vector.shape_cast %98 : vector<1x32x64xbf16> to vector<32x64xbf16>
    %cst_48 = arith.constant dense<0.000000e+00> : vector<16x64xf32>
    %100 = tpu.matmul %90, %99, %cst_48 {dimension_numbers = #tpu.dot_dimension_numbers<[1], [0], [0], [1], [0, 0, 1, 1], [], []>} : vector<16x32xbf16>, vector<32x64xbf16>, vector<16x64xf32> -> vector<16x64xf32>
    %101 = arith.addf %97, %100 : vector<16x64xf32>
    %c0_49 = arith.constant 0 : index
    %c0_50 = arith.constant 0 : index
    %102 = vector.load %arg10[%c0_49, %c0_50] : memref<1x64xf32, #tpu.memory_space<vmem>>, vector<1x64xf32>
    %103 = vector.broadcast %102 : vector<1x64xf32> to vector<16x64xf32>
    %104 = arith.addf %101, %103 : vector<16x64xf32>
    %cst_51 = arith.constant 0.000000e+00 : f32
    %105 = vector.broadcast %cst_51 : f32 to vector<16x64xf32>
    %106 = arith.maximumf %104, %105 : vector<16x64xf32>
    %107 = arith.truncf %106 : vector<16x64xf32> to vector<16x64xbf16>
    %c0_52 = arith.constant 0 : index
    %c0_53 = arith.constant 0 : index
    %108 = vector.load %arg11[%c0_52, %c0_53] : memref<16x64xbf16, #tpu.memory_space<vmem>>, vector<16x64xbf16>
    tpu.vector_store %arg11[%c0_52, %c0_53], %107 {strides = array<i32>} : memref<16x64xbf16, #tpu.memory_space<vmem>>, vector<16x64xbf16>,
    return
  }
  func.func @transform_0(%arg0: i32) -> (i32, i32) {
    %c0_i32 = arith.constant 0 : i32
    %c0_i32_0 = arith.constant 0 : i32
    return %arg0, %c0_i32 : i32, i32
  }
  func.func @transform_1(%arg0: i32) -> (i32, i32) {
    %c0_i32 = arith.constant 0 : i32
    %c0_i32_0 = arith.constant 0 : i32
    return %arg0, %c0_i32 : i32, i32
  }
  func.func @transform_2(%arg0: i32) -> (i32, i32) {
    %c0_i32 = arith.constant 0 : i32
    %c0_i32_0 = arith.constant 0 : i32
    %c0_i32_1 = arith.constant 0 : i32
    return %c0_i32, %c0_i32_0 : i32, i32
  }
  func.func @transform_3(%arg0: i32) -> (i32, i32) {
    %c0_i32 = arith.constant 0 : i32
    %c0_i32_0 = arith.constant 0 : i32
    %c0_i32_1 = arith.constant 0 : i32
    return %c0_i32, %c0_i32_0 : i32, i32
  }
  func.func @transform_4(%arg0: i32) -> (i32, i32) {
    %c0_i32 = arith.constant 0 : i32
    %c0_i32_0 = arith.constant 0 : i32
    %c0_i32_1 = arith.constant 0 : i32
    return %c0_i32, %c0_i32_0 : i32, i32
  }
  func.func @transform_5(%arg0: i32) -> (i32, i32) {
    %c0_i32 = arith.constant 0 : i32
    %c0_i32_0 = arith.constant 0 : i32
    %c0_i32_1 = arith.constant 0 : i32
    return %c0_i32, %c0_i32_0 : i32, i32
  }
  func.func @transform_6(%arg0: i32) -> (i32, i32, i32) {
    %c0_i32 = arith.constant 0 : i32
    %c0_i32_0 = arith.constant 0 : i32
    %c0_i32_1 = arith.constant 0 : i32
    %c0_i32_2 = arith.constant 0 : i32
    return %c0_i32, %c0_i32_0, %c0_i32_1 : i32, i32, i32
  }
  func.func @transform_7(%arg0: i32) -> (i32, i32) {
    %c0_i32 = arith.constant 0 : i32
    %c0_i32_0 = arith.constant 0 : i32
    %c0_i32_1 = arith.constant 0 : i32
    return %c0_i32, %c0_i32_0 : i32, i32
  }
  func.func @transform_8(%arg0: i32) -> (i32, i32, i32) {
    %c0_i32 = arith.constant 0 : i32
    %c0_i32_0 = arith.constant 0 : i32
    %c0_i32_1 = arith.constant 0 : i32
    %c0_i32_2 = arith.constant 0 : i32
    return %c0_i32, %c0_i32_0, %c0_i32_1 : i32, i32, i32
  }
  func.func @transform_9(%arg0: i32) -> (i32, i32) {
    %c0_i32 = arith.constant 0 : i32
    %c0_i32_0 = arith.constant 0 : i32
    %c0_i32_1 = arith.constant 0 : i32
    return %c0_i32, %c0_i32_0 : i32, i32
  }
  func.func @transform_10(%arg0: i32) -> (i32, i32) {
    %c0_i32 = arith.constant 0 : i32
    %c0_i32_0 = arith.constant 0 : i32
    return %arg0, %c0_i32 : i32, i32
  }
}

</mosaic_0001>

<bundles_post_ra>
// kernel: tpu_custom_call.1
= control target key start
LH: loop header
LB: loop body
LE: loop exit
PB: predicated region body
PF: predicated region fallthrough
CT: control target
= control target key end

     0   :  { %vm58_vm0 = vcmask 1044480   ;;  %v1017_v0 = vmov 0.0   ;;  %vm1018_vm1 = vmmov 0   ;;  %vm135_vm2 = vcmask 1043456   ;;  %s1261_s0 = inlined_call_operand.vmem [shape: bf16[16,32], index: 0, kind: input, shape index: {}]   ;;  %s1262_s1 = inlined_call_operand.vmem [shape: bf16[2,10], index: 1, kind: input, shape index: {}]   ;;  %s1263_s2 = inlined_call_operand.vmem [shape: bf16[10,40], index: 2, kind: input, shape index: {}]   ;;  %s1264_s3 = inlined_call_operand.vmem [shape: f32[1,40], index: 3, kind: input, shape index: {}]   ;;  %s1265_s4 = inlined_call_operand.vmem [shape: bf16[40,20], index: 4, kind: input, shape index: {}]   ;;  %s1266_s5 = inlined_call_operand.vmem [shape: f32[1,20], index: 5, kind: input, shape index: {}]   ;;  %s1267_s6 = inlined_call_operand.vmem [shape: bf16[3,52,32], index: 6, kind: input, shape index: {}]   ;;  %s1268_s7 = inlined_call_operand.vmem [shape: f32[1,32], index: 7, kind: input, shape index: {}]   ;;  %s1269_s8 = inlined_call_operand.vmem [shape: bf16[3,32,64], index: 8, kind: input, shape index: {}]   ;;  %s1270_s9 = inlined_call_operand.vmem [shape: f32[1,64], index: 9, kind: input, shape index: {}]   ;;  %s1271_s10 = inlined_call_operand.hbm [shape: bf16[16,64], index: 10, kind: output, shape index: {}]  }
   0x1   :  { %888 = vmatprep.subr.bf16.mxu0 %v1017_v0  ;;  %v972_v1 = vld [vmem:[%s1263_s2] sm:$0x1f]   ;;  %894 = vmatprep.subr.bf16.mxu1 %v1017_v0  ;;  %v973_v2 = vld [vmem:[%s1265_s4 + $0x10] ss:$0 sps:$4 sm:$0xff]   ;;  %vm54_vm3 = vcmask 80896  }
   0x2   :  { %890 = vmatprep.mubr.msk.bf16.mxu0 %vm1018_vm1, %v1017_v0  ;;  %900 = vmatprep.mubr.msk.bf16.mxu1 %vm1018_vm1, %v1017_v0  ;;  %v60_v3 = vsel %vm58_vm0, %v972_v1, 0  ;;  %v39_v4 = vld [vmem:[%s1262_s1] sm:$0x1]  ;;  %v137_v5 = vsel %vm135_vm2, %v973_v2, 0 }
   0x3   :  { %889 = vmatpush3.bf16.msra.mxu0 %v60_v3  ;;  %895 = vmatpush3.bf16.msra.mxu1 %v137_v5 }
   0x4   :  { %904 = vmatprep.subr.bf16.mxu0 %v1017_v0  ;;  %896 = vmatprep.subr.bf16.mxu1 %v1017_v0 }
   0x6   :  { %891 = vmatmul.mubr.msk.bf16.vlgmr.msra.gmra.mxu0 %vm54_vm3, %v39_v4 }
   0x7   :  { %912 = vmatprep.mubr.msk.bf16.mxu0 %vm1018_vm1, %v1017_v0 }
   0x8   :  { %15 = vsyncpa [#allocation3], 0  ;;  %v974_v6 = vld [vmem:[%s1265_s4 + $0x8] sm:$0xff]   ;;  %v975_v7 = vld [vmem:[%s1265_s4] sm:$0xff]   ;;  %vm131_vm4 = vcmask 326656   ;;  %vm354_vm5 = vcmask 1041408   ;;  %v185_v26 = vlaneseq }
   0x9   :  { %897 = vmatpush3.bf16.msra.mxu1 %v974_v6  ;;  %v793_v8 = vld [vmem:[%s1264_s3] ss:$0 sm:$0xff]  ;;  %v976_v16 = vld [vmem:[%s1267_s6 + $0x34] ss:$0 sps:$4 sm:$0x33]   ;;  %v977_v19 = vld [vmem:[%s1267_s6 + $0x2c] sm:$0xff]  }
   0xa   :  { %898 = vmatprep.subr.bf16.mxu1 %v1017_v0  ;;  %v979_v17 = vld [vmem:[%s1267_s6 + $0x18] ss:$0 sps:$4 sm:$0x33]   ;;  %v356_v18 = vsel %vm354_vm5, %v976_v16, 0  ;;  %v981_v21 = vld [vmem:[%s1267_s6 + $0x10] sm:$0xff]   ;;  %v978_v22 = vld [vmem:[%s1267_s6 + $0x24] sm:$0xff]  }
   0xb   :  { %905 = vmatpush3.bf16.msra.mxu0 %v356_v18  ;;  %v424_v20 = vsel %vm354_vm5, %v979_v17, 0  ;;  %v980_v23 = vld [vmem:[%s1267_s6 + $0x1c] sm:$0xff]   ;;  %v1019_v24 = vmov 1966171168   ;;  %v186_v29 = vshrl.u32 %v185_v26, 7  ;;  %v984_v43 = vld [vmem:[%s1267_s6 + $0x8] sm:$0xff]  }
   0xc   :  { %906 = vmatprep.subr.bf16.mxu0 %v1017_v0  ;;  %v183_v25 = vunpack.c.l.s4 %v1019_v24  ;;  %v796_v27 = vld [vmem:[%s1266_s5] ss:$0 sm:$0xff]  ;;  %s1020_s18 = smov 32   ;;  %v983_v56 = vld [vmem:[%s1267_s6 + $0x50] ss:$0 sps:$4 sm:$0x33]  }
   0xd   :  { %899 = vmatpush3.bf16.msra.mxu1 %v975_v7  ;;  %v202_v40 = vsub.s32 0, %v186_v29  ;;  %v986_v48 = vld [vmem:[%s1267_s6] sm:$0xff]   ;;  %v242_v53 = vadd.s32 8, %v186_v29  ;;  %v247_v54 = vand.u32 7, %v186_v29  ;;  %vm236_vm10 = vcmask 261120   ;;  %v985_v6 = vld [vmem:[%s1267_s6 + $0x48] sm:$0xff]  }
   0xe   :  { %916 = vmatprep.subr.bf16.mxu1 %v1017_v0  ;;  %v184_v28 = vunpack.c.0.s8 %v183_v25  ;;  %v982_v57 = vld [vmem:[%s1261_s0] sm:$0xff]   ;;  %vm351_vm11 = vcmask 424960   ;;  %v1021_v58 = vmov 0   ;;  %v500_v62 = vsel %vm354_vm5, %v983_v56, 0  ;;  %v989_v24 = vld [vmem:[%s1269_s8 + $0x18] sm:$0xff]   ;;  %v990_v25 = vld [vmem:[%s1269_s8 + $0x10] sm:$0xff]  }
   0xf   :  { %907 = vmatpush3.bf16.msra.mxu0 %v977_v19  ;;  %v254_v55 = vand.u32 7, %v242_v53  ;;  %vm267_vm6 = vcmp.ne.s32.totalorder %v247_v54, 0  ;;  %vm1156_vm12 = vcmp.ne.s32.totalorder %v247_v54, 7  ;;  %vm278_vm13 = vcmask 1040384   ;;  %v988_v19 = vld [vmem:[%s1267_s6 + $0x38] sm:$0xff]   ;;  %v991_v26 = vld [vmem:[%s1269_s8 + $0x8] sm:$0xff]  }
  0x10   :  { %908 = vmatprep.subr.bf16.mxu0 %v1017_v0  ;;  %v187_v34 = vsub.s32 %v184_v28, %v186_v29  ;;  %vm286_vm8 = vmpackc.low %vm267_vm6, %vm267_vm6  ;;  %vm279_vm15 = vsmask.f32 256  ;;  %vm298_vm5 = vcmask 1047552   ;;  %vm299_vm6 = vsmask.f32 7424  ;;  %v994_v53 = vld [vmem:[%s1269_s8 + $0x20] sm:$0xff]  }
  0x11   :  { %vm268_vm7 = vcmp.ne.s32.totalorder %v254_v55, 0  ;;  %v288_v59 = vsel %vm286_vm8, 65537, %v1021_v58  ;;  %vm1161_vm14 = vcmp.ne.s32.totalorder %v254_v55, 7  ;;  %vm306_vm0 = vmpackc.low %vm1156_vm12, %vm1156_vm12  ;;  %s1022_s5 = smov [#allocation2]  }
  0x12   :  { %vm287_vm9 = vmpackc.low %vm268_vm7, %vm268_vm7  ;;  %s782_s17 = sshll.u32 %s1022_s5, 4  ;;  %s783_s17 = int_to_ptr.vmem [resolvable:$true] %s782_s17 }
  0x13   :  { %909 = vmatpush3.bf16.msra.mxu0 %v978_v22  ;;  %v289_v60 = vsel %vm287_vm9, 65537, %v1021_v58  ;;  %vm307_vm2 = vmpackc.low %vm1161_vm14, %vm1161_vm14  ;;  %p1000_p1 = scmp.lt.s32.totalorder %s783_s17, %s783_s17 }
  0x14   :  { %910 = vmatprep.subr.bf16.mxu0 %v1017_v0  ;;  %v804_v5 = vcombine.low %v288_v59, %v289_v60  ;;  %vm1178_vm3 = vmand %vm278_vm13, %vm279_vm15 }
  0x15   :  { %vm1198_vm7 = vmand %vm298_vm5, %vm299_vm6 }
  0x17   :  { %911 = vmatpush3.bf16.msra.mxu0 %v980_v23 }
  0x18   :  { %928 = vmatprep.subr.bf16.mxu0 %v1017_v0 }
  0xc6   :  { %v96_v9 = vpop.f32.mrf.mxu0 }
  0xc7   :  { %v97_v10 = vadd.f32 %v793_v8, %v96_v9 }
  0xc8   :  { %v892_v11 = vpop.f32.mrf.mxu0 }
  0xc9   :  { %v102_v12 = vmax.f32 %v97_v10, 0.0 }
  0xca   :  { %v99_v13 = vpop.f32.mrf.mxu0 }
  0xcb   :  { %v103_v14 = vpack.c.bf16 %v102_v12, %v102_v12  ;;  %v987_v12 = vld [vmem:[%s1267_s6 + $0x40] sm:$0xff]   ;;  %v308_v13 = vsel %vm306_vm0, 65537, %v1021_v58 }
  0xcc   :  { %v893_v15 = vpop.f32.mrf.mxu0 }
  0xcd   :  { %901 = vmatmul.mubr.msk.bf16.vlgmr.msra.gmra.mxu1 %vm131_vm4, %v103_v14  ;;  %vm1182_vm4 = vcmp.ne.s16.totalorder %v804_v5, 0  ;;  %v309_v14 = vsel %vm307_vm2, 65537, %v1021_v58  ;;  %v853_v5 = vld [vmem:[%s1270_s9] ss:$0 sm:$0xff]  ;;  %s995_s9 = scalar_lea.vmem %s783_s17, 128 }
  0xce   :  { %924 = vmatprep.mubr.msk.bf16.mxu1 %vm1018_vm1, %v1017_v0  ;;  %917 = vmatpush3.bf16.msra.mxu1 %v424_v20  ;;  %v805_v18 = vcombine.low %v308_v13, %v309_v14  ;;  %p996_p0 = scmp.ne.s32.totalorder %s783_s17, %s995_s9  ;;  %p1001_p2 = scmp.lt.s32.totalorder %s995_s9, %s995_s9 }
  0xcf   :  { %918 = vmatprep.subr.bf16.mxu1 %v1017_v0 }
  0xd0   :  { %vm1207_vm8 = vcmp.ne.s16.totalorder %v805_v18, 0  ;;  %p1002_p3 = por %p1001_p2, %p1000_p1 }
  0xd2   :  { %919 = vmatpush3.bf16.msra.mxu1 %v981_v21  ;;  %p1003_p4 = pnand %p1002_p3, %p996_p0 }
  0xd3   :  { %920 = vmatprep.subr.bf16.mxu1 %v1017_v0 }
  0xd6   :  { %921 = vmatpush3.bf16.msra.mxu1 %v984_v43 }
  0xd7   :  { %922 = vmatprep.subr.bf16.mxu1 %v1017_v0 }
  0xda   :  { %923 = vmatpush3.bf16.msra.mxu1 %v986_v48 }
  0xdb   :  { %940 = vmatprep.subr.bf16.mxu1 %v1017_v0 }
 0x18d   :  { %v173_v30 = vpop.f32.mrf.mxu1 }
 0x18e   :  { %v174_v31 = vadd.f32 %v796_v27, %v173_v30  ;;  %v993_v27 = vld [vmem:[%s1269_s8] sm:$0xff]  }
 0x18f   :  { %v902_v32 = vpop.f32.mrf.mxu1 }
 0x190   :  { %v179_v33 = vmax.f32 %v174_v31, 0.0 }
 0x191   :  { %v176_v35 = vpop.f32.mrf.mxu1 }
 0x192   :  { %v180_v36 = vpack.c.bf16 %v179_v33, %v179_v33 }
 0x193   :  { %v903_v37 = vpop.f32.mrf.mxu1 }
 0x194   :  { %v188_v38 = vrot.slane %v180_v36, %v187_v34 }
 0x196   :  { %v195_v39 = vrot.slane %v188_v38, %v187_v34 }
 0x198   :  { %v197_v41 = vunpack.i.h.s16 %v195_v39  ;;  %v801_v42 = vpack.i.b16 %v195_v39, %v195_v39  ;;  %v835_v39 = vld [vmem:[%s1268_s7] ss:$0 sm:$0xff] }
 0x19a   :  { %v199_v44 = vpack.i.b16 %v197_v41, %v197_v41  ;;  %v203_v45 = vrot.slane %v801_v42, %v202_v40 }
 0x19c   :  { %v207_v46 = vrot.slane %v199_v44, %v202_v40  ;;  %v209_v47 = vpack.i.b16 %v203_v45, %v203_v45 }
 0x19e   :  { %v216_v49 = vpack.i.b16 %v207_v46, %v207_v46  ;;  %v214_v50 = vrot.slane %v209_v47, %v202_v40 }
 0x1a0   :  { %v221_v51 = vrot.slane %v216_v49, %v202_v40  ;;  %v992_v49 = vld [vmem:[%s1269_s8 + $0x28] sm:$0xff]  }
 0x1a2   :  { %v803_v52 = vcombine.low %v214_v50, %v221_v51 }
 0x1a4   :  { %234 = vrot.lane.b32.xlu0 %v803_v52, %s1020_s18 }
 0x216   :  { %v235_v61 = vpop.permute.xlu0 %234 }
 0x217   :  { %v239_v1 = vsel %vm236_vm10, %v982_v57, %v235_v61 }
 0x218   :  { %v271_v3 = vshrl.u32 %v239_v1, 16  ;;  %v274_v4 = vshll.u32 %v239_v1, 16  ;;  %913 = vmatmul.mubr.msk.bf16.vlgmr.msra.gmra.mxu0 %vm351_vm11, %v239_v1 }
 0x219   :  { %929 = vmatpush3.bf16.msra.mxu0 %v500_v62  ;;  %936 = vmatprep.mubr.msk.bf16.mxu0 %vm1018_vm1, %v1017_v0 }
 0x21a   :  { %v273_v7 = vrot.slane %v271_v3, 7  ;;  %930 = vmatprep.subr.bf16.mxu0 %v1017_v0  ;;  %v295_v10 = vrot.slane %v274_v4, 1 }
 0x21c   :  { %v276_v9 = vor.u32 %v274_v4, %v273_v7  ;;  %v296_v17 = vor.u32 %v295_v10, %v271_v3 }
 0x21d   :  { %931 = vmatpush3.bf16.msra.mxu0 %v985_v6 }
 0x21e   :  { %932 = vmatprep.subr.bf16.mxu0 %v1017_v0  ;;  %v281_v15 = vsel %vm1178_vm3, 0, %v276_v9  ;;  %v301_v21 = vsel %vm1198_vm7, %v296_v17, 0 }
 0x21f   :  { %v294_v16 = vsel %vm1182_vm4, %v281_v15, 0  ;;  %v314_v23 = vsel %vm1207_vm8, %v301_v21, 0 }
 0x220   :  { %925 = vmatmul.mubr.msk.bf16.vlgmr.msra.gmra.mxu1 %vm351_vm11, %v294_v16 }
 0x221   :  { %933 = vmatpush3.bf16.msra.mxu0 %v987_v12  ;;  %944 = vmatprep.mubr.msk.bf16.mxu1 %vm1018_vm1, %v1017_v0 }
 0x222   :  { %934 = vmatprep.subr.bf16.mxu0 %v1017_v0  ;;  %941 = vmatpush3.bf16.msra.mxu1 %v989_v24 }
 0x223   :  { %942 = vmatprep.subr.bf16.mxu1 %v1017_v0 }
 0x225   :  { %935 = vmatpush3.bf16.msra.mxu0 %v988_v19 }
 0x226   :  { %948 = vmatprep.subr.bf16.mxu0 %v1017_v0  ;;  %943 = vmatpush3.bf16.msra.mxu1 %v990_v25 }
 0x227   :  { %956 = vmatprep.subr.bf16.mxu1 %v1017_v0 }
 0x228   :  { %937 = vmatmul.mubr.msk.bf16.vlgmr.msra.gmra.mxu0 %vm351_vm11, %v314_v23 }
 0x229   :  { %952 = vmatprep.mubr.msk.bf16.mxu0 %vm1018_vm1, %v1017_v0  ;;  %949 = vmatpush3.bf16.msra.mxu0 %v991_v26 }
 0x22a   :  { %950 = vmatprep.subr.bf16.mxu0 %v1017_v0 }
 0x22d   :  { %951 = vmatpush3.bf16.msra.mxu0 %v993_v27 }
 0x2d8   :  { %v392_v28 = vpop.f32.mrf.mxu0 }
 0x2da   :  { %v914_v29 = vpop.f32.mrf.mxu0 }
 0x2dc   :  { %v395_v30 = vpop.f32.mrf.mxu0 }
 0x2de   :  { %v915_v31 = vpop.f32.mrf.mxu0 }
 0x2e0   :  { %v460_v32 = vpop.f32.mrf.mxu1 }
 0x2e1   :  { %v461_v36 = vadd.f32 %v460_v32, %v392_v28 }
 0x2e2   :  { %v926_v33 = vpop.f32.mrf.mxu1 }
 0x2e4   :  { %v463_v34 = vpop.f32.mrf.mxu1 }
 0x2e5   :  { %v464_v41 = vadd.f32 %v463_v34, %v395_v30 }
 0x2e6   :  { %v927_v35 = vpop.f32.mrf.mxu1 }
 0x2e8   :  { %v536_v37 = vpop.f32.mrf.mxu0 }
 0x2e9   :  { %v543_v38 = vadd.f32 %v536_v37, %v461_v36 }
 0x2ea   :  { %v938_v40 = vpop.f32.mrf.mxu0 }
 0x2eb   :  { %v552_v43 = vadd.f32 %v835_v39, %v543_v38 }
 0x2ec   :  { %v539_v42 = vpop.f32.mrf.mxu0 }
 0x2ed   :  { %v544_v44 = vadd.f32 %v539_v42, %v464_v41  ;;  %v554_v47 = vmax.f32 %v552_v43, 0.0 }
 0x2ee   :  { %v939_v45 = vpop.f32.mrf.mxu0 }
 0x2ef   :  { %v553_v46 = vadd.f32 %v835_v39, %v544_v44 }
 0x2f1   :  { %v555_v48 = vmax.f32 %v553_v46, 0.0 }
 0x2f3   :  { %v556_v50 = vpack.c.bf16 %v555_v48, %v554_v47 }
 0x2f5   :  { %v558_v51 = vshrl.u32 %v556_v50, 16  ;;  %v561_v52 = vshll.u32 %v556_v50, 16  ;;  %945 = vmatmul.mubr.msk.bf16.vlgmr.msra.gmra.mxu1 %vm236_vm10, %v556_v50 }
 0x2f6   :  { %957 = vmatpush3.bf16.msra.mxu1 %v992_v49  ;;  %960 = vmatprep.mubr.msk.bf16.mxu1 %vm1018_vm1, %v1017_v0  ;;  %vm774_vm1 = vcmask 519168  }
 0x2f7   :  { %958 = vmatprep.subr.bf16.mxu1 %v1017_v0  ;;  %v560_v54 = vrot.slane %v558_v51, 7  ;;  %v567_v55 = vrot.slane %v561_v52, 1 }
 0x2f9   :  { %v563_v56 = vor.u32 %v561_v52, %v560_v54  ;;  %v568_v57 = vor.u32 %v567_v55, %v558_v51 }
 0x2fa   :  { %959 = vmatpush3.bf16.msra.mxu1 %v994_v53 }
 0x2fb   :  { %v565_v58 = vsel %vm1178_vm3, 0, %v563_v56  ;;  %v570_v59 = vsel %vm1198_vm7, %v568_v57, 0 }
 0x2fc   :  { %v566_v60 = vsel %vm1182_vm4, %v565_v58, 0  ;;  %v571_v61 = vsel %vm1207_vm8, %v570_v59, 0 }
 0x2fd   :  { %953 = vmatmul.mubr.msk.bf16.vlgmr.msra.gmra.mxu0 %vm236_vm10, %v566_v60  ;;  %961 = vmatmul.mubr.msk.bf16.vlgmr.msra.gmra.mxu1 %vm236_vm10, %v571_v61 }
 0x3b5   :  { %v629_v0 = vpop.f32.mrf.mxu1 }
 0x3b7   :  { %v946_v62 = vpop.f32.mrf.mxu1 }
 0x3b9   :  { %v632_v63 = vpop.f32.mrf.mxu1 }
 0x3bb   :  { %v947_v1 = vpop.f32.mrf.mxu1 }
 0x3bd   :  { %v685_v2 = vpop.f32.mrf.mxu0  ;;  %v746_v3 = vpop.f32.mrf.mxu1 }
 0x3be   :  { %v686_v4 = vadd.f32 %v685_v2, %v629_v0 }
 0x3bf   :  { %v954_v6 = vpop.f32.mrf.mxu0  ;;  %v962_v7 = vpop.f32.mrf.mxu1 }
 0x3c0   :  { %v753_v8 = vadd.f32 %v746_v3, %v686_v4 }
 0x3c1   :  { %v688_v9 = vpop.f32.mrf.mxu0  ;;  %v749_v10 = vpop.f32.mrf.mxu1 }
 0x3c2   :  { %v762_v11 = vadd.f32 %v853_v5, %v753_v8  ;;  %v689_v12 = vadd.f32 %v688_v9, %v632_v63 }
 0x3c3   :  { %v955_v13 = vpop.f32.mrf.mxu0  ;;  %v963_v14 = vpop.f32.mrf.mxu1 }
 0x3c4   :  { %v764_v15 = vmax.f32 %v762_v11, 0.0  ;;  %v754_v16 = vadd.f32 %v749_v10, %v689_v12 }
 0x3c6   :  { %v856_v17 = vpack.c.bf16 %v764_v15, %v764_v15  ;;  %v763_v18 = vadd.f32 %v853_v5, %v754_v16 }
 0x3c8   :  { %775 = vst.msk [vmem:[#allocation2] sm:$0xf] %vm774_vm1, %v856_v17  ;;  %v765_v19 = vmax.f32 %v763_v18, 0.0 }
 0x3ca   :  { %v857_v20 = vpack.c.bf16 %v765_v19, %v765_v19 }
 0x3cc   :  { %776 = vst.msk [vmem:[#allocation2 + $0x4] sm:$0xf] %vm774_vm1, %v857_v20 }
 0x3cd   :  { %1006 = shalt.err (!%p1003_p4)
}
 0x3ce   :  { %s1023_s18 = smov 64   ;;  %s1024_s2 = smov 4  }
 0x3cf   :  { %788 = dma.vmem_to_hbm [thread:$0]  %s783_s17, 128, %s1271_s10, [#allocation3], %s1023_s18, %s1023_s18, %s1024_s2  }
 0x3d0   :  { %1015 = dma.done.wait [#allocation3], 128  }
 0x3d1   :  { %1016 = vsyncadd [#allocation3], 4294967168 }
 0x3d2   :  { %792 = vsyncpa [#allocation3], 1 }

</bundles_post_ra>
